<compile_context>
chip_gen: v6e
topology: v6e:2x2x1
jax: 0.10.0
libtpu: 0.0.40
codegen_flags: <defaults>
</compile_context>

<pallas_src>
import functools

import jax
import jax.numpy as jnp
from jax.experimental import pallas as pl
from jax.experimental.pallas import tpu as pltpu

INPUT_SIZE = 324
H1 = 64
H2 = 16
OUT = 1


def mlp_kernel(x_ref, w1_ref, b1_ref, w2_ref, b2_ref, w3_ref, b3_ref, o_ref):
    """Fused 3-layer MLP forward for one batch tile (all operands in VMEM).

    x_ref  : (bb, 324)   w1_ref : (324, 64)  b1_ref : (1, 64)
    w2_ref : (64, 16)    b2_ref : (1, 16)
    w3_ref : (16, 1)     b3_ref : (1, 1)
    o_ref  : (1, bb)     <- lane-dense output row
    """
    x = x_ref[...]                                                      # [bb, 324]

    # fc1 + ReLU (MXU)
    h1 = jnp.dot(x, w1_ref[...], preferred_element_type=jnp.float32)   # [bb, 64]
    h1 = jnp.maximum(h1 + b1_ref[...], 0.0)

    # fc2 + ReLU (MXU)
    h2 = jnp.dot(h1, w2_ref[...], preferred_element_type=jnp.float32)  # [bb, 16]
    h2 = jnp.maximum(h2 + b2_ref[...], 0.0)

    # output layer (16 -> 1) off the MXU:
    # transpose to (16, bb) (XLU), scale each row by its w3 weight (VPU,
    # lane-broadcast of the (16,1) column), reduce over sublanes -> (1, bb).
    h2t = h2.T                                                          # [16, bb]
    logits = jnp.sum(h2t * w3_ref[...], axis=0, keepdims=True)          # [1, bb]
    logits = logits + b3_ref[...]                                       # [1, bb]

    # numerically stable sigmoid: exp argument is always <= 0 (EUP exp)
    e = jnp.exp(-jnp.abs(logits))
    o_ref[...] = jnp.where(logits >= 0.0, 1.0 / (1.0 + e), e / (1.0 + e))


@functools.partial(jax.jit, static_argnames=("block_b",))
def net_forward(x, w1, b1, w2, b2, w3, b3, *, block_b=2048):
    """Forward pass of Net. x: [B, 324] float32 -> [B, 1] float32."""
    B, F = x.shape
    assert F == INPUT_SIZE
    assert block_b % 128 == 0, "block_b must be a multiple of 128 (lane width)"

    # Clamp the batch tile for tiny batches; keep it a multiple of 128 so the
    # lane-dense (1, bb) output block stays layout-friendly.
    bb = min(block_b, pl.cdiv(B, 128) * 128)
    num_tiles = pl.cdiv(B, bb)
    b_pad = num_tiles * bb
    if b_pad != B:
        # Ragged batch: fall back to zero padding (one extra HBM pass over x).
        x = jnp.pad(x, ((0, b_pad - B), (0, 0)))
    # else: fast path — no padding copy, x streamed straight from HBM.

    # Feature dims are small: every weight/bias is a single full VMEM-resident
    # block; only the batch axis is tiled across the grid.
    full = lambda shape: pl.BlockSpec(shape, lambda i: (0,) * len(shape))

    out_row = pl.pallas_call(
        mlp_kernel,
        out_shape=jax.ShapeDtypeStruct((1, b_pad), jnp.float32),
        grid_spec=pltpu.PrefetchScalarGridSpec(
            num_scalar_prefetch=0,
            grid=(num_tiles,),
            in_specs=[
                pl.BlockSpec((bb, F), lambda i: (i, 0)),   # x tile (streamed)
                full((INPUT_SIZE, H1)),                    # w1
                full((1, H1)),                             # b1
                full((H1, H2)),                            # w2
                full((1, H2)),                             # b2
                full((H2, OUT)),                           # w3 (16, 1) column
                full((1, OUT)),                            # b3
            ],
            # Lane-dense output: (1, bb) row blocks along the lane axis.
            out_specs=pl.BlockSpec((1, bb), lambda i: (0, i)),
        ),
        compiler_params=pltpu.CompilerParams(
            dimension_semantics=("parallel",),   # megacore-shardable batch axis
        ),
    )(x, w1, b1, w2, b2, w3, b3)

    # Back to the PyTorch output shape [B, 1], dropping padded rows.
    return out_row[0, :B].reshape(B, 1)


def init_params(key):
    """Deterministic init mimicking torch.nn.Linear default (U[-1/sqrt(in), 1/sqrt(in)]).
    Weights stored as [in, out] (transposed vs. PyTorch's [out, in])."""
    def linear(k, fan_in, fan_out):
        kw, kb = jax.random.split(k)
        bound = 1.0 / jnp.sqrt(fan_in)
        w = jax.random.uniform(kw, (fan_in, fan_out), jnp.float32, -bound, bound)
        b = jax.random.uniform(kb, (1, fan_out), jnp.float32, -bound, bound)
        return w, b

    k1, k2, k3 = jax.random.split(key, 3)
    w1, b1 = linear(k1, INPUT_SIZE, H1)
    w2, b2 = linear(k2, H1, H2)
    w3, b3 = linear(k3, H2, OUT)
    return w1, b1, w2, b2, w3, b3


def reference_forward(x, w1, b1, w2, b2, w3, b3):
    h1 = jnp.maximum(x @ w1 + b1, 0.0)
    h2 = jnp.maximum(h1 @ w2 + b2, 0.0)
    return jax.nn.sigmoid(h2 @ w3 + b3)


if __name__ == "__main__":
    key = jax.random.PRNGKey(0)
    kx1, kx2, kx3, kp = jax.random.split(key, 4)
    params = init_params(kp)

    # 1) Small batch (pads up to one 128-row tile internally).
    B1 = 8
    x1 = jax.random.normal(kx1, (B1, INPUT_SIZE), jnp.float32)
    out1 = jax.block_until_ready(net_forward(x1, *params))
    ref1 = reference_forward(x1, *params)
    assert out1.shape == (B1, OUT), out1.shape
    assert jnp.allclose(out1, ref1, atol=3e-5, rtol=1e-4), (
        f"max abs err = {jnp.max(jnp.abs(out1 - ref1))}"
    )

    # 2) Ragged batch: multiple grid tiles + padded tail tile.
    B2 = 300
    x2 = jax.random.normal(kx2, (B2, INPUT_SIZE), jnp.float32)
    out2 = jax.block_until_ready(net_forward(x2, *params, block_b=128))
    ref2 = reference_forward(x2, *params)
    assert out2.shape == (B2, OUT), out2.shape
    assert jnp.allclose(out2, ref2, atol=3e-5, rtol=1e-4), (
        f"max abs err = {jnp.max(jnp.abs(out2 - ref2))}"
    )

    # 3) Divisible batch: multi-tile fast path, no padding copy.
    B3 = 512
    x3 = jax.random.normal(kx3, (B3, INPUT_SIZE), jnp.float32)
    out3 = jax.block_until_ready(net_forward(x3, *params, block_b=256))
    ref3 = reference_forward(x3, *params)
    assert out3.shape == (B3, OUT), out3.shape
    assert jnp.allclose(out3, ref3, atol=3e-5, rtol=1e-4), (
        f"max abs err = {jnp.max(jnp.abs(out3 - ref3))}"
    )

    print("KERNEL_OK")
</pallas_src>

<mosaic_0001>
module attributes {stable_mosaic.version = 11 : i64} {
  func.func @mlp_kernel(%arg0: i32, %arg1: memref<128x324xf32, #tpu.memory_space<vmem>>, %arg2: memref<324x64xf32, #tpu.memory_space<vmem>>, %arg3: memref<1x64xf32, #tpu.memory_space<vmem>>, %arg4: memref<64x16xf32, #tpu.memory_space<vmem>>, %arg5: memref<1x16xf32, #tpu.memory_space<vmem>>, %arg6: memref<16x1xf32, #tpu.memory_space<vmem>>, %arg7: memref<1x1xf32, #tpu.memory_space<vmem>>, %arg8: memref<1x128xf32, #tpu.memory_space<vmem>>) attributes {dimension_semantics = [#tpu.dimension_semantics<parallel>], iteration_bounds = array<i64: 1>, scalar_prefetch = 0 : i64, scratch_operands = 0 : i64, tpu.core_type = #tpu.core_type<tc>, window_params = [{transform_indices = @transform_0, window_bounds = array<i64: 128, 324>}, {pipeline_mode = #tpu.pipeline_mode<synchronous>, transform_indices = @transform_1, window_bounds = array<i64: 324, 64>}, {pipeline_mode = #tpu.pipeline_mode<synchronous>, transform_indices = @transform_2, window_bounds = array<i64: 1, 64>}, {pipeline_mode = #tpu.pipeline_mode<synchronous>, transform_indices = @transform_3, window_bounds = array<i64: 64, 16>}, {pipeline_mode = #tpu.pipeline_mode<synchronous>, transform_indices = @transform_4, window_bounds = array<i64: 1, 16>}, {pipeline_mode = #tpu.pipeline_mode<synchronous>, transform_indices = @transform_5, window_bounds = array<i64: 16, 1>}, {pipeline_mode = #tpu.pipeline_mode<synchronous>, transform_indices = @transform_6, window_bounds = array<i64: 1, 1>}, {transform_indices = @transform_7, window_bounds = array<i64: 1, 128>}]} {
    %c0 = arith.constant 0 : index
    %c0_0 = arith.constant 0 : index
    %0 = vector.load %arg1[%c0, %c0_0] : memref<128x324xf32, #tpu.memory_space<vmem>>, vector<128x324xf32>
    %c0_1 = arith.constant 0 : index
    %c0_2 = arith.constant 0 : index
    %1 = vector.load %arg2[%c0_1, %c0_2] : memref<324x64xf32, #tpu.memory_space<vmem>>, vector<324x64xf32>
    %cst = arith.constant dense<0.000000e+00> : vector<128x64xf32>
    %2 = tpu.matmul %0, %1, %cst {dimension_numbers = #tpu.dot_dimension_numbers<[1], [0], [0], [1], [0, 0, 1, 1], [], []>} : vector<128x324xf32>, vector<324x64xf32>, vector<128x64xf32> -> vector<128x64xf32>
    %c0_3 = arith.constant 0 : index
    %c0_4 = arith.constant 0 : index
    %3 = vector.load %arg3[%c0_3, %c0_4] : memref<1x64xf32, #tpu.memory_space<vmem>>, vector<1x64xf32>
    %4 = vector.broadcast %3 : vector<1x64xf32> to vector<128x64xf32>
    %5 = arith.addf %2, %4 : vector<128x64xf32>
    %cst_5 = arith.constant 0.000000e+00 : f32
    %6 = vector.broadcast %cst_5 : f32 to vector<128x64xf32>
    %7 = arith.maximumf %5, %6 : vector<128x64xf32>
    %c0_6 = arith.constant 0 : index
    %c0_7 = arith.constant 0 : index
    %8 = vector.load %arg4[%c0_6, %c0_7] : memref<64x16xf32, #tpu.memory_space<vmem>>, vector<64x16xf32>
    %cst_8 = arith.constant dense<0.000000e+00> : vector<128x16xf32>
    %9 = tpu.matmul %7, %8, %cst_8 {dimension_numbers = #tpu.dot_dimension_numbers<[1], [0], [0], [1], [0, 0, 1, 1], [], []>} : vector<128x64xf32>, vector<64x16xf32>, vector<128x16xf32> -> vector<128x16xf32>
    %c0_9 = arith.constant 0 : index
    %c0_10 = arith.constant 0 : index
    %10 = vector.load %arg5[%c0_9, %c0_10] : memref<1x16xf32, #tpu.memory_space<vmem>>, vector<1x16xf32>
    %11 = vector.broadcast %10 : vector<1x16xf32> to vector<128x16xf32>
    %12 = arith.addf %9, %11 : vector<128x16xf32>
    %cst_11 = arith.constant 0.000000e+00 : f32
    %13 = vector.broadcast %cst_11 : f32 to vector<128x16xf32>
    %14 = arith.maximumf %12, %13 : vector<128x16xf32>
    %15 = tpu.transpose %14, [1, 0] : vector<128x16xf32> -> vector<16x128xf32>
    %c0_12 = arith.constant 0 : index
    %c0_13 = arith.constant 0 : index
    %16 = vector.load %arg6[%c0_12, %c0_13] : memref<16x1xf32, #tpu.memory_space<vmem>>, vector<16x1xf32>
    %17 = vector.broadcast %16 : vector<16x1xf32> to vector<16x128xf32>
    %18 = arith.mulf %15, %17 : vector<16x128xf32>
    %cst_14 = arith.constant dense<0.000000e+00> : vector<128xf32>
    %19 = vector.multi_reduction <add>, %18, %cst_14 [0] : vector<16x128xf32> to vector<128xf32>
    %20 = vector.shape_cast %19 : vector<128xf32> to vector<1x128xf32>
    %c0_15 = arith.constant 0 : index
    %c0_16 = arith.constant 0 : index
    %21 = vector.load %arg7[%c0_15, %c0_16] : memref<1x1xf32, #tpu.memory_space<vmem>>, vector<1x1xf32>
    %22 = vector.broadcast %21 : vector<1x1xf32> to vector<1x128xf32>
    %23 = arith.addf %20, %22 : vector<1x128xf32>
    %24 = math.absf %23 : vector<1x128xf32>
    %cst_17 = arith.constant 0.000000e+00 : f32
    %25 = vector.broadcast %cst_17 : f32 to vector<1x128xf32>
    %26 = arith.subf %25, %24 : vector<1x128xf32>
    %27 = math.exp %26 : vector<1x128xf32>
    %cst_18 = arith.constant 0.000000e+00 : f32
    %28 = vector.broadcast %cst_18 : f32 to vector<1x128xf32>
    %29 = arith.cmpf oge, %23, %28 : vector<1x128xf32>
    %cst_19 = arith.constant 1.000000e+00 : f32
    %30 = vector.broadcast %cst_19 : f32 to vector<1x128xf32>
    %31 = arith.addf %30, %27 : vector<1x128xf32>
    %cst_20 = arith.constant 1.000000e+00 : f32
    %32 = vector.broadcast %cst_20 : f32 to vector<1x128xf32>
    %33 = arith.divf %32, %31 : vector<1x128xf32>
    %cst_21 = arith.constant 1.000000e+00 : f32
    %34 = vector.broadcast %cst_21 : f32 to vector<1x128xf32>
    %35 = arith.addf %34, %27 : vector<1x128xf32>
    %36 = arith.divf %27, %35 : vector<1x128xf32>
    %37 = arith.select %29, %33, %36 : vector<1x128xi1>, vector<1x128xf32>
    %c0_22 = arith.constant 0 : index
    %c0_23 = arith.constant 0 : index
    %38 = vector.load %arg8[%c0_22, %c0_23] : memref<1x128xf32, #tpu.memory_space<vmem>>, vector<1x128xf32>
    tpu.vector_store %arg8[%c0_22, %c0_23], %37 {strides = array<i32>} : memref<1x128xf32, #tpu.memory_space<vmem>>, vector<1x128xf32>,
    return
  }
  func.func @transform_0(%arg0: i32) -> (i32, i32) {
    %c0_i32 = arith.constant 0 : i32
    %c0_i32_0 = arith.constant 0 : i32
    return %arg0, %c0_i32 : i32, i32
  }
  func.func @transform_1(%arg0: i32) -> (i32, i32) {
    %c0_i32 = arith.constant 0 : i32
    %c0_i32_0 = arith.constant 0 : i32
    %c0_i32_1 = arith.constant 0 : i32
    return %c0_i32, %c0_i32_0 : i32, i32
  }
  func.func @transform_2(%arg0: i32) -> (i32, i32) {
    %c0_i32 = arith.constant 0 : i32
    %c0_i32_0 = arith.constant 0 : i32
    %c0_i32_1 = arith.constant 0 : i32
    return %c0_i32, %c0_i32_0 : i32, i32
  }
  func.func @transform_3(%arg0: i32) -> (i32, i32) {
    %c0_i32 = arith.constant 0 : i32
    %c0_i32_0 = arith.constant 0 : i32
    %c0_i32_1 = arith.constant 0 : i32
    return %c0_i32, %c0_i32_0 : i32, i32
  }
  func.func @transform_4(%arg0: i32) -> (i32, i32) {
    %c0_i32 = arith.constant 0 : i32
    %c0_i32_0 = arith.constant 0 : i32
    %c0_i32_1 = arith.constant 0 : i32
    return %c0_i32, %c0_i32_0 : i32, i32
  }
  func.func @transform_5(%arg0: i32) -> (i32, i32) {
    %c0_i32 = arith.constant 0 : i32
    %c0_i32_0 = arith.constant 0 : i32
    %c0_i32_1 = arith.constant 0 : i32
    return %c0_i32, %c0_i32_0 : i32, i32
  }
  func.func @transform_6(%arg0: i32) -> (i32, i32) {
    %c0_i32 = arith.constant 0 : i32
    %c0_i32_0 = arith.constant 0 : i32
    %c0_i32_1 = arith.constant 0 : i32
    return %c0_i32, %c0_i32_0 : i32, i32
  }
  func.func @transform_7(%arg0: i32) -> (i32, i32) {
    %c0_i32 = arith.constant 0 : i32
    %c0_i32_0 = arith.constant 0 : i32
    return %c0_i32, %arg0 : i32, i32
  }
}

</mosaic_0001>

<bundles_post_ra>
// kernel: net_forward.1
= control target key start
LH: loop header
LB: loop body
LE: loop exit
PB: predicated region body
PF: predicated region fallthrough
CT: control target
= control target key end

     0   :  { %vm173_vm0 = vcmask 1043456   ;;  %vm124_vm1 = vcmask 556032   ;;  %vm498_vm2 = vcmask 523264   ;;  %s1440_s1 = inlined_call_operand.vmem [shape: f32[324,64], index: 1, kind: input, shape index: {}]   ;;  %s1441_s0 = inlined_call_operand.vmem [shape: f32[128,324], index: 0, kind: input, shape index: {}]   ;;  %s1442_s3 = inlined_call_operand.vmem [shape: f32[64,16], index: 3, kind: input, shape index: {}]   ;;  %s1443_s6 = inlined_call_operand.<no memory space> [shape: f32[1,1], index: 6, kind: input, shape index: {}]   ;;  %s1444_s2 = inlined_call_operand.vmem [shape: f32[1,64], index: 2, kind: input, shape index: {}]   ;;  %s1445_s5 = inlined_call_operand.vmem [shape: f32[16,1], index: 5, kind: input, shape index: {}]   ;;  %s1446_s4 = inlined_call_operand.vmem [shape: f32[1,16], index: 4, kind: input, shape index: {}]   ;;  %s1447_s7 = inlined_call_operand.vmem [shape: f32[1,128], index: 7, kind: output, shape index: {}]  }
   0x1   :  { %v107_v0 = vld [vmem:[%s1440_s1 + $0xf8] sm:$0xff]  ;;  %v106_v2 = vld [vmem:[%s1440_s1 + $0xf0] sm:$0xff]  ;;  %v105_v4 = vld [vmem:[%s1440_s1 + $0xe8] sm:$0xff] }
   0x2   :  { %v91_v1 = vld [vmem:[%s1440_s1 + $0x78] sm:$0xff]  ;;  %822 = vmatprep.subr.mxu0 %v107_v0  ;;  %v90_v3 = vld [vmem:[%s1440_s1 + $0x70] sm:$0xff]  ;;  %v89_v5 = vld [vmem:[%s1440_s1 + $0x68] sm:$0xff] }
   0x3   :  { %823 = vmatpush3.msra.mxu0 %v91_v1  ;;  %v104_v6 = vld [vmem:[%s1440_s1 + $0xe0] sm:$0xff]  ;;  %v103_v8 = vld [vmem:[%s1440_s1 + $0xd8] sm:$0xff]  ;;  %v102_v12 = vld [vmem:[%s1440_s1 + $0xd0] sm:$0xff] }
   0x4   :  { %824 = vmatprep.subr.mxu0 %v106_v2  ;;  %v88_v7 = vld [vmem:[%s1440_s1 + $0x60] sm:$0xff]  ;;  %v87_v10 = vld [vmem:[%s1440_s1 + $0x58] sm:$0xff]  ;;  %v114_v13 = vld [vmem:[%s1440_s1 + $0x130] sm:$0xff] }
   0x5   :  { %825 = vmatpush3.msra.mxu0 %v90_v3  ;;  %v116_v9 = vld [vmem:[%s1440_s1 + $0x140] sm:$0xf]  ;;  %v115_v11 = vld [vmem:[%s1440_s1 + $0x138] sm:$0xff]  ;;  %v86_v14 = vld [vmem:[%s1440_s1 + $0x50] sm:$0xff] }
   0x6   :  { %826 = vmatprep.subr.mxu0 %v105_v4  ;;  %951 = vmatprep.subr.msk.mxu1 %vm173_vm0, %v116_v9  ;;  %v101_v15 = vld [vmem:[%s1440_s1 + $0xc8] sm:$0xff]  ;;  %v100_v18 = vld [vmem:[%s1440_s1 + $0xc0] sm:$0xff]  ;;  %v99_v21 = vld [vmem:[%s1440_s1 + $0xb8] sm:$0xff] }
   0x7   :  { %827 = vmatpush3.msra.mxu0 %v89_v5  ;;  %952 = vmatpush3.msk.msra.mxu1 %vm173_vm0, %v116_v9  ;;  %v113_v16 = vld [vmem:[%s1440_s1 + $0x128] sm:$0xff]  ;;  %v112_v19 = vld [vmem:[%s1440_s1 + $0x120] sm:$0xff]  ;;  %v111_v22 = vld [vmem:[%s1440_s1 + $0x118] sm:$0xff] }
   0x8   :  { %828 = vmatprep.subr.mxu0 %v104_v6  ;;  %953 = vmatprep.subr.mxu1 %v115_v11  ;;  %v85_v17 = vld [vmem:[%s1440_s1 + $0x48] sm:$0xff]  ;;  %v84_v20 = vld [vmem:[%s1440_s1 + $0x40] sm:$0xff]  ;;  %v83_v23 = vld [vmem:[%s1440_s1 + $0x38] sm:$0xff] }
   0x9   :  { %829 = vmatpush3.msra.mxu0 %v88_v7  ;;  %954 = vmatpush3.msra.mxu1 %v115_v11  ;;  %v98_v24 = vld [vmem:[%s1440_s1 + $0xb0] sm:$0xff]  ;;  %v29_v27 = vld [vmem:[%s1441_s0 + $0x8] sm:$0xff]  ;;  %v96_v31 = vld [vmem:[%s1440_s1 + $0xa0] sm:$0xff] }
   0xa   :  { %830 = vmatprep.subr.mxu0 %v103_v8  ;;  %955 = vmatprep.subr.mxu1 %v114_v13  ;;  %v110_v25 = vld [vmem:[%s1440_s1 + $0x110] sm:$0xff]  ;;  %v97_v28 = vld [vmem:[%s1440_s1 + $0xa8] sm:$0xff]  ;;  %v80_v32 = vld [vmem:[%s1440_s1 + $0x20] sm:$0xff] }
   0xb   :  { %831 = vmatpush3.msra.mxu0 %v87_v10  ;;  %956 = vmatpush3.msra.mxu1 %v114_v13  ;;  %v82_v26 = vld [vmem:[%s1440_s1 + $0x30] sm:$0xff]  ;;  %v81_v29 = vld [vmem:[%s1440_s1 + $0x28] sm:$0xff]  ;;  %v108_v33 = vld [vmem:[%s1440_s1 + $0x100] sm:$0xff] }
   0xc   :  { %832 = vmatprep.subr.mxu0 %v102_v12  ;;  %957 = vmatprep.subr.mxu1 %v113_v16  ;;  %v109_v30 = vld [vmem:[%s1440_s1 + $0x108] sm:$0xff]  ;;  %v95_v34 = vld [vmem:[%s1440_s1 + $0x98] sm:$0xff]  ;;  %v30_v36 = vld [vmem:[%s1441_s0 + $0x10] sm:$0xff] }
   0xd   :  { %833 = vmatpush3.msra.mxu0 %v86_v14  ;;  %958 = vmatpush3.msra.mxu1 %v113_v16  ;;  %v79_v35 = vld [vmem:[%s1440_s1 + $0x18] sm:$0xff]  ;;  %v94_v37 = vld [vmem:[%s1440_s1 + $0x90] sm:$0xff]  ;;  %v33_v38 = vld [vmem:[%s1441_s0 + $0x28] sm:$0xff] }
   0xe   :  { %834 = vmatprep.subr.mxu0 %v101_v15  ;;  %959 = vmatprep.subr.mxu1 %v112_v19  ;;  %v78_v39 = vld [vmem:[%s1440_s1 + $0x10] sm:$0xff]  ;;  %v36_v40 = vld [vmem:[%s1441_s0 + $0x40] sm:$0xff]  ;;  %v93_v41 = vld [vmem:[%s1440_s1 + $0x88] sm:$0xff] }
   0xf   :  { %835 = vmatpush3.msra.mxu0 %v85_v17  ;;  %960 = vmatpush3.msra.mxu1 %v112_v19  ;;  %v77_v42 = vld [vmem:[%s1440_s1 + $0x8] sm:$0xff]  ;;  %v92_v43 = vld [vmem:[%s1440_s1 + $0x80] sm:$0xff]  ;;  %v39_v44 = vld [vmem:[%s1441_s0 + $0x58] sm:$0xff] }
  0x10   :  { %836 = vmatprep.subr.mxu0 %v100_v18  ;;  %961 = vmatprep.subr.mxu1 %v111_v22  ;;  %v76_v45 = vld [vmem:[%s1440_s1] sm:$0xff]  ;;  %v42_v46 = vld [vmem:[%s1441_s0 + $0x70] sm:$0xff]  ;;  %v490_v47 = vld [vmem:[%s1442_s3 + $0x38] sm:$0xff] }
  0x11   :  { %837 = vmatpush3.msra.mxu0 %v84_v20  ;;  %962 = vmatpush3.msra.mxu1 %v111_v22  ;;  %v28_v48 = vld [vmem:[%s1441_s0] sm:$0xff]  ;;  %v489_v50 = vld [vmem:[%s1442_s3 + $0x30] sm:$0xff]  ;;  %v45_v51 = vld [vmem:[%s1441_s0 + $0x88] sm:$0xff] }
  0x12   :  { %838 = vmatprep.subr.mxu0 %v99_v21  ;;  %963 = vmatprep.subr.mxu1 %v110_v25  ;;  %v32_v49 = vld [vmem:[%s1441_s0 + $0x20] sm:$0xff]  ;;  %v31_v53 = vld [vmem:[%s1441_s0 + $0x18] sm:$0xff]  ;;  %v488_v54 = vld [vmem:[%s1442_s3 + $0x28] sm:$0xff] }
  0x13   :  { %839 = vmatpush3.msra.mxu0 %v83_v23  ;;  %241 = vmatprep.mubr.f32.mxu0 %v29_v27  ;;  %v48_v52 = vld [vmem:[%s1441_s0 + $0xa0] sm:$0xff]  ;;  %v35_v55 = vld [vmem:[%s1441_s0 + $0x38] sm:$0xff]  ;;  %v54_v58 = vld [vmem:[%s1441_s0 + $0xd0] sm:$0xff] }
  0x14   :  { %840 = vmatprep.subr.mxu0 %v98_v24  ;;  %964 = vmatpush3.msra.mxu1 %v110_v25  ;;  %v51_v56 = vld [vmem:[%s1441_s0 + $0xb8] sm:$0xff]  ;;  %v487_v57 = vld [vmem:[%s1442_s3 + $0x20] sm:$0xff]  ;;  %v34_v59 = vld [vmem:[%s1441_s0 + $0x30] sm:$0xff] }
  0x15   :  { %841 = vmatpush3.msra.mxu0 %v82_v26  ;;  %965 = vmatprep.subr.mxu1 %v109_v30  ;;  %v486_v60 = vld [vmem:[%s1442_s3 + $0x18] sm:$0xff]  ;;  %v38_v61 = vld [vmem:[%s1441_s0 + $0x50] sm:$0xff]  ;;  %v57_v62 = vld [vmem:[%s1441_s0 + $0xe8] sm:$0xff] }
  0x16   :  { %842 = vmatprep.subr.mxu0 %v97_v28  ;;  %966 = vmatpush3.msra.mxu1 %v109_v30  ;;  %v60_v63 = vld [vmem:[%s1441_s0 + $0x100] sm:$0xff]  ;;  %v37_v0 = vld [vmem:[%s1441_s0 + $0x48] sm:$0xff]  ;;  %v63_v2 = vld [vmem:[%s1441_s0 + $0x118] sm:$0xff] }
  0x17   :  { %843 = vmatpush3.msra.mxu0 %v81_v29  ;;  %967 = vmatprep.subr.mxu1 %v108_v33  ;;  %v41_v1 = vld [vmem:[%s1441_s0 + $0x68] sm:$0xff]  ;;  %v66_v3 = vld [vmem:[%s1441_s0 + $0x130] sm:$0xff]  ;;  %v40_v4 = vld [vmem:[%s1441_s0 + $0x60] sm:$0xff] }
  0x18   :  { %844 = vmatprep.subr.mxu0 %v96_v31  ;;  %968 = vmatpush3.msra.mxu1 %v108_v33  ;;  %v44_v5 = vld [vmem:[%s1441_s0 + $0x80] sm:$0xff]  ;;  %v69_v6 = vld [vmem:[%s1441_s0 + $0x148] sm:$0xff]  ;;  %v43_v8 = vld [vmem:[%s1441_s0 + $0x78] sm:$0xff]  ;;  %v1040_v33 = vmov 0  }
  0x19   :  { %845 = vmatpush3.msra.mxu0 %v80_v32  ;;  %969 = vmatprep.mubr.msk.f32.mxu1 %vm124_vm1, %v30_v36  ;;  %v72_v7 = vld [vmem:[%s1441_s0 + $0x160] sm:$0xff]  ;;  %v47_v9 = vld [vmem:[%s1441_s0 + $0x98] sm:$0xff]  ;;  %v46_v11 = vld [vmem:[%s1441_s0 + $0x90] sm:$0xff] }
  0x1a   :  { %846 = vmatprep.subr.mxu0 %v95_v34  ;;  %970 = vmatmul.mubr.msk.f32.vlgmr.msra.gmra.mxu1 %vm124_vm1, %v33_v38  ;;  %v75_v10 = vld [vmem:[%s1441_s0 + $0x178] sm:$0xff]  ;;  %v50_v12 = vld [vmem:[%s1441_s0 + $0xb0] sm:$0xff]  ;;  %v49_v13 = vld [vmem:[%s1441_s0 + $0xa8] sm:$0xff]  ;;  %v12_v34 = vstv %s1443_s6 }
  0x1b   :  { %847 = vmatpush3.msra.mxu0 %v79_v35  ;;  %972 = vmatprep.mubr.msk.f32.mxu1 %vm124_vm1, %v36_v40  ;;  %v53_v14 = vld [vmem:[%s1441_s0 + $0xc8] sm:$0xff]  ;;  %v52_v15 = vld [vmem:[%s1441_s0 + $0xc0] sm:$0xff]  ;;  %v55_v17 = vld [vmem:[%s1441_s0 + $0xd8] sm:$0xff]  ;;  %13 = vst [vmem:[#allocation2] sm:$0x1] %v12_v34 }
  0x1c   :  { %848 = vmatprep.subr.mxu0 %v94_v37  ;;  %993 = vmatprep.subr.mxu1 %v490_v47  ;;  %v56_v16 = vld [vmem:[%s1441_s0 + $0xe0] sm:$0xff]  ;;  %v59_v18 = vld [vmem:[%s1441_s0 + $0xf8] sm:$0xff]  ;;  %v58_v19 = vld [vmem:[%s1441_s0 + $0xf0] sm:$0xff] }
  0x1d   :  { %849 = vmatpush3.msra.mxu0 %v78_v39  ;;  %994 = vmatpush3.msra.mxu1 %v490_v47  ;;  %v62_v20 = vld [vmem:[%s1441_s0 + $0x110] sm:$0xff]  ;;  %v61_v21 = vld [vmem:[%s1441_s0 + $0x108] sm:$0xff]  ;;  %v64_v23 = vld [vmem:[%s1441_s0 + $0x120] sm:$0xff] }
  0x1e   :  { %850 = vmatprep.subr.mxu0 %v93_v41  ;;  %973 = vmatmul.mubr.msk.f32.gmra.mxu1 %vm124_vm1, %v39_v44  ;;  %v65_v22 = vld [vmem:[%s1441_s0 + $0x128] sm:$0xff]  ;;  %v68_v24 = vld [vmem:[%s1441_s0 + $0x140] sm:$0xff]  ;;  %v67_v25 = vld [vmem:[%s1441_s0 + $0x138] sm:$0xff] }
  0x1f   :  { %851 = vmatpush3.msra.mxu0 %v77_v42  ;;  %975 = vmatprep.mubr.msk.f32.mxu1 %vm124_vm1, %v42_v46  ;;  %v71_v26 = vld [vmem:[%s1441_s0 + $0x158] sm:$0xff]  ;;  %v70_v27 = vld [vmem:[%s1441_s0 + $0x150] sm:$0xff]  ;;  %v73_v29 = vld [vmem:[%s1441_s0 + $0x168] sm:$0xff] }
  0x20   :  { %852 = vmatprep.subr.mxu0 %v92_v43  ;;  %995 = vmatprep.subr.mxu1 %v489_v50  ;;  %v74_v28 = vld [vmem:[%s1441_s0 + $0x170] sm:$0xff]  ;;  %v484_v31 = vld [vmem:[%s1442_s3 + $0x8] sm:$0xff]  ;;  %v483_v32 = vld [vmem:[%s1442_s3] sm:$0xff] }
  0x21   :  { %853 = vmatpush3.msra.mxu0 %v76_v45  ;;  %996 = vmatpush3.msra.mxu1 %v489_v50  ;;  %v485_v30 = vld [vmem:[%s1442_s3 + $0x10] sm:$0xff]  ;;  %v1394_v39 = vld [vmem:[%s1444_s2] ss:$0 sm:$0xff] }
  0x22   :  { %242 = vmatmul.mubr.f32.vlgmr.msra.gmra.mxu0 %v28_v48  ;;  %976 = vmatmul.mubr.msk.f32.gmra.mxu1 %vm124_vm1, %v45_v51  ;;  %v761_v35 = vld [vmem:[#allocation2] sm:$0x1] }
  0x23   :  { %246 = vmatprep.mubr.f32.mxu0 %v32_v49  ;;  %978 = vmatprep.mubr.msk.f32.mxu1 %vm124_vm1, %v48_v52 }
  0x24   :  { %997 = vmatprep.subr.mxu1 %v488_v54  ;;  %1035 = vset.pattern.permute.xlu1 %v1040_v33 }
  0x25   :  { %998 = vmatpush3.msra.mxu1 %v488_v54  ;;  %1034 = vset.pattern.permute.xlu0 %v1040_v33 }
  0x26   :  { %247 = vmatmul.mubr.f32.gmra.mxu0 %v31_v53  ;;  %979 = vmatmul.mubr.msk.f32.gmra.mxu1 %vm124_vm1, %v51_v56 }
  0x27   :  { %251 = vmatprep.mubr.f32.mxu0 %v35_v55  ;;  %999 = vmatprep.subr.mxu1 %v487_v57 }
  0x28   :  { %981 = vmatprep.mubr.msk.f32.mxu1 %vm124_vm1, %v54_v58  ;;  %1000 = vmatpush3.msra.mxu1 %v487_v57 }
  0x29   :  { %1001 = vmatprep.subr.mxu1 %v486_v60  ;;  %764 = vperm.xlu1 %1035, %v761_v35  }
  0x2a   :  { %252 = vmatmul.mubr.f32.gmra.mxu0 %v34_v59  ;;  %1002 = vmatpush3.msra.mxu1 %v486_v60 }
  0x2b   :  { %256 = vmatprep.mubr.f32.mxu0 %v38_v61  ;;  %982 = vmatmul.mubr.msk.f32.gmra.mxu1 %vm124_vm1, %v57_v62 }
  0x2c   :  { %984 = vmatprep.mubr.msk.f32.mxu1 %vm124_vm1, %v60_v63  ;;  %1003 = vmatprep.subr.mxu1 %v485_v30 }
  0x2d   :  { %1004 = vmatpush3.msra.mxu1 %v485_v30 }
  0x2e   :  { %257 = vmatmul.mubr.f32.gmra.mxu0 %v37_v0  ;;  %1005 = vmatprep.subr.mxu1 %v484_v31 }
  0x2f   :  { %261 = vmatprep.mubr.f32.mxu0 %v41_v1  ;;  %985 = vmatmul.mubr.msk.f32.gmra.mxu1 %vm124_vm1, %v63_v2 }
  0x30   :  { %987 = vmatprep.mubr.msk.f32.mxu1 %vm124_vm1, %v66_v3  ;;  %1006 = vmatpush3.msra.mxu1 %v484_v31 }
  0x31   :  { %1007 = vmatprep.subr.mxu1 %v483_v32 }
  0x32   :  { %262 = vmatmul.mubr.f32.gmra.mxu0 %v40_v4  ;;  %1008 = vmatpush3.msra.mxu1 %v483_v32 }
  0x33   :  { %266 = vmatprep.mubr.f32.mxu0 %v44_v5  ;;  %988 = vmatmul.mubr.msk.f32.gmra.mxu1 %vm124_vm1, %v69_v6 }
  0x34   :  { %990 = vmatprep.mubr.msk.f32.mxu1 %vm124_vm1, %v72_v7 }
  0x36   :  { %267 = vmatmul.mubr.f32.gmra.mxu0 %v43_v8 }
  0x37   :  { %271 = vmatprep.mubr.f32.mxu0 %v47_v9  ;;  %991 = vmatmul.mubr.msk.f32.gmra.mxu1 %vm124_vm1, %v75_v10 }
  0x3a   :  { %272 = vmatmul.mubr.f32.gmra.mxu0 %v46_v11 }
  0x3b   :  { %276 = vmatprep.mubr.f32.mxu0 %v50_v12 }
  0x3e   :  { %277 = vmatmul.mubr.f32.gmra.mxu0 %v49_v13 }
  0x3f   :  { %281 = vmatprep.mubr.f32.mxu0 %v53_v14 }
  0x42   :  { %282 = vmatmul.mubr.f32.gmra.mxu0 %v52_v15 }
  0x43   :  { %286 = vmatprep.mubr.f32.mxu0 %v56_v16 }
  0x46   :  { %287 = vmatmul.mubr.f32.gmra.mxu0 %v55_v17 }
  0x47   :  { %291 = vmatprep.mubr.f32.mxu0 %v59_v18 }
  0x4a   :  { %292 = vmatmul.mubr.f32.gmra.mxu0 %v58_v19 }
  0x4b   :  { %296 = vmatprep.mubr.f32.mxu0 %v62_v20 }
  0x4e   :  { %297 = vmatmul.mubr.f32.gmra.mxu0 %v61_v21 }
  0x4f   :  { %301 = vmatprep.mubr.f32.mxu0 %v65_v22 }
  0x52   :  { %302 = vmatmul.mubr.f32.gmra.mxu0 %v64_v23 }
  0x53   :  { %306 = vmatprep.mubr.f32.mxu0 %v68_v24 }
  0x56   :  { %307 = vmatmul.mubr.f32.gmra.mxu0 %v67_v25 }
  0x57   :  { %311 = vmatprep.mubr.f32.mxu0 %v71_v26 }
  0x5a   :  { %312 = vmatmul.mubr.f32.gmra.mxu0 %v70_v27 }
  0x5b   :  { %316 = vmatprep.mubr.f32.mxu0 %v74_v28 }
  0x5e   :  { %317 = vmatmul.mubr.f32.gmra.mxu0 %v73_v29 }
  0xda   :  { %v971_v37 = vpop.f32.mrf.mxu1 }
  0xdc   :  { %v388_v42 = vpop.f32.mrf.mxu1 }
  0xde   :  { %v974_v48 = vpop.f32.mrf.mxu1 }
  0xe0   :  { %v398_v55 = vpop.f32.mrf.mxu1 }
  0xe2   :  { %v854_v36 = vpop.f32.mrf.mxu0  ;;  %v977_v62 = vpop.f32.mrf.mxu1 }
  0xe4   :  { %v855_v38 = vpop.f32.mrf.mxu0  ;;  %v408_v5 = vpop.f32.mrf.mxu1 }
  0xe5   :  { %v856_v40 = vadd.f32 %v855_v38, %v854_v36 }
  0xe6   :  { %v857_v41 = vpop.f32.mrf.mxu0  ;;  %v980_v12 = vpop.f32.mrf.mxu1 }
  0xe7   :  { %v244_v43 = vadd.f32 %v856_v40, %v1394_v39 }
  0xe8   :  { %v858_v44 = vpop.f32.mrf.mxu0  ;;  %v418_v19 = vpop.f32.mrf.mxu1 }
  0xe9   :  { %v859_v45 = vadd.f32 %v858_v44, %v857_v41  ;;  %v389_v46 = vadd.f32 %v388_v42, %v244_v43 }
  0xea   :  { %v860_v47 = vpop.f32.mrf.mxu0 }
  0xeb   :  { %v249_v49 = vadd.f32 %v859_v45, %v1394_v39  ;;  %v467_v50 = vmax.f32 %v389_v46, 0.0  ;;  %v983_v26 = vpop.f32.mrf.mxu1 }
  0xec   :  { %v861_v51 = vpop.f32.mrf.mxu0 }
  0xed   :  { %v394_v52 = vadd.f32 %v971_v37, %v249_v49  ;;  %v862_v53 = vadd.f32 %v861_v51, %v860_v47  ;;  %1009 = vmatprep.mubr.msk.f32.mxu1 %vm498_vm2, %v467_v50  ;;  %v428_v33 = vpop.f32.mrf.mxu1 }
  0xee   :  { %v863_v54 = vpop.f32.mrf.mxu0 }
  0xef   :  { %v468_v56 = vmax.f32 %v394_v52, 0.0  ;;  %v254_v57 = vadd.f32 %v862_v53, %v1394_v39  ;;  %v986_v41 = vpop.f32.mrf.mxu1 }
  0xf0   :  { %v864_v58 = vpop.f32.mrf.mxu0 }
  0xf1   :  { %v865_v59 = vadd.f32 %v864_v58, %v863_v54  ;;  %v399_v60 = vadd.f32 %v398_v55, %v254_v57  ;;  %1010 = vmatmul.mubr.msk.f32.vlgmr.msra.gmra.mxu1 %vm498_vm2, %v468_v56 }
  0xf2   :  { %v866_v61 = vpop.f32.mrf.mxu0 }
  0xf3   :  { %v259_v63 = vadd.f32 %v865_v59, %v1394_v39  ;;  %v469_v0 = vmax.f32 %v399_v60, 0.0 }
  0xf4   :  { %v867_v1 = vpop.f32.mrf.mxu0 }
  0xf5   :  { %v404_v2 = vadd.f32 %v974_v48, %v259_v63  ;;  %v868_v3 = vadd.f32 %v867_v1, %v866_v61  ;;  %1012 = vmatprep.mubr.msk.f32.mxu1 %vm498_vm2, %v469_v0  ;;  %v438_v48 = vpop.f32.mrf.mxu1 }
  0xf6   :  { %v869_v4 = vpop.f32.mrf.mxu0 }
  0xf7   :  { %v470_v6 = vmax.f32 %v404_v2, 0.0  ;;  %v264_v7 = vadd.f32 %v868_v3, %v1394_v39  ;;  %v989_v55 = vpop.f32.mrf.mxu1 }
  0xf8   :  { %v870_v8 = vpop.f32.mrf.mxu0 }
  0xf9   :  { %v871_v9 = vadd.f32 %v870_v8, %v869_v4  ;;  %v409_v10 = vadd.f32 %v408_v5, %v264_v7  ;;  %1013 = vmatmul.mubr.msk.f32.gmra.mxu1 %vm498_vm2, %v470_v6 }
  0xfa   :  { %v872_v11 = vpop.f32.mrf.mxu0 }
  0xfb   :  { %v269_v13 = vadd.f32 %v871_v9, %v1394_v39  ;;  %v471_v14 = vmax.f32 %v409_v10, 0.0 }
  0xfc   :  { %v873_v15 = vpop.f32.mrf.mxu0 }
  0xfd   :  { %v414_v16 = vadd.f32 %v977_v62, %v269_v13  ;;  %v874_v17 = vadd.f32 %v873_v15, %v872_v11  ;;  %1015 = vmatprep.mubr.msk.f32.mxu1 %vm498_vm2, %v471_v14  ;;  %v448_v62 = vpop.f32.mrf.mxu1 }
  0xfe   :  { %v875_v18 = vpop.f32.mrf.mxu0 }
  0xff   :  { %v472_v20 = vmax.f32 %v414_v16, 0.0  ;;  %v274_v21 = vadd.f32 %v874_v17, %v1394_v39  ;;  %v992_v5 = vpop.f32.mrf.mxu1 }
 0x100   :  { %v876_v22 = vpop.f32.mrf.mxu0 }
 0x101   :  { %v877_v23 = vadd.f32 %v876_v22, %v875_v18  ;;  %v419_v24 = vadd.f32 %v418_v19, %v274_v21  ;;  %1016 = vmatmul.mubr.msk.f32.gmra.mxu1 %vm498_vm2, %v472_v20  ;;  %v740_v22 = vld [vmem:[%s1445_s5] sm:$0xff] }
 0x102   :  { %v878_v25 = vpop.f32.mrf.mxu0  ;;  %744 = vperm.xlu0 %1034, %v740_v22  }
 0x103   :  { %v279_v27 = vadd.f32 %v877_v23, %v1394_v39  ;;  %v473_v28 = vmax.f32 %v419_v24, 0.0  ;;  %v741_v23 = vld [vmem:[%s1445_s5 + $0x8] sm:$0xff] }
 0x104   :  { %v879_v29 = vpop.f32.mrf.mxu0 }
 0x105   :  { %v424_v30 = vadd.f32 %v980_v12, %v279_v27  ;;  %v880_v31 = vadd.f32 %v879_v29, %v878_v25  ;;  %1018 = vmatprep.mubr.msk.f32.mxu1 %vm498_vm2, %v473_v28  ;;  %v458_v12 = vpop.f32.mrf.mxu1 }
 0x106   :  { %v881_v32 = vpop.f32.mrf.mxu0  ;;  %749 = vperm.xlu0 %1034, %v741_v23  }
 0x107   :  { %v474_v34 = vmax.f32 %v424_v30, 0.0  ;;  %v284_v35 = vadd.f32 %v880_v31, %v1394_v39 }
 0x108   :  { %v882_v36 = vpop.f32.mrf.mxu0 }
 0x109   :  { %v883_v37 = vadd.f32 %v882_v36, %v881_v32  ;;  %v429_v38 = vadd.f32 %v428_v33, %v284_v35  ;;  %1019 = vmatmul.mubr.msk.f32.gmra.mxu1 %vm498_vm2, %v474_v34 }
 0x10a   :  { %v884_v40 = vpop.f32.mrf.mxu0 }
 0x10b   :  { %v289_v42 = vadd.f32 %v883_v37, %v1394_v39  ;;  %v475_v43 = vmax.f32 %v429_v38, 0.0 }
 0x10c   :  { %v885_v44 = vpop.f32.mrf.mxu0 }
 0x10d   :  { %v434_v45 = vadd.f32 %v983_v26, %v289_v42  ;;  %v886_v46 = vadd.f32 %v885_v44, %v884_v40  ;;  %1021 = vmatprep.mubr.msk.f32.mxu1 %vm498_vm2, %v475_v43 }
 0x10e   :  { %v887_v47 = vpop.f32.mrf.mxu0 }
 0x10f   :  { %v476_v49 = vmax.f32 %v434_v45, 0.0  ;;  %v294_v50 = vadd.f32 %v886_v46, %v1394_v39 }
 0x110   :  { %v888_v51 = vpop.f32.mrf.mxu0 }
 0x111   :  { %v889_v52 = vadd.f32 %v888_v51, %v887_v47  ;;  %v439_v53 = vadd.f32 %v438_v48, %v294_v50  ;;  %1022 = vmatmul.mubr.msk.f32.gmra.mxu1 %vm498_vm2, %v476_v49 }
 0x112   :  { %v890_v54 = vpop.f32.mrf.mxu0 }
 0x113   :  { %v299_v56 = vadd.f32 %v889_v52, %v1394_v39  ;;  %v477_v57 = vmax.f32 %v439_v53, 0.0 }
 0x114   :  { %v891_v58 = vpop.f32.mrf.mxu0 }
 0x115   :  { %v444_v59 = vadd.f32 %v986_v41, %v299_v56  ;;  %v892_v60 = vadd.f32 %v891_v58, %v890_v54  ;;  %1024 = vmatprep.mubr.msk.f32.mxu1 %vm498_vm2, %v477_v57 }
 0x116   :  { %v893_v61 = vpop.f32.mrf.mxu0 }
 0x117   :  { %v478_v63 = vmax.f32 %v444_v59, 0.0  ;;  %v304_v0 = vadd.f32 %v892_v60, %v1394_v39 }
 0x118   :  { %v894_v1 = vpop.f32.mrf.mxu0 }
 0x119   :  { %v895_v2 = vadd.f32 %v894_v1, %v893_v61  ;;  %v449_v3 = vadd.f32 %v448_v62, %v304_v0  ;;  %1025 = vmatmul.mubr.msk.f32.gmra.mxu1 %vm498_vm2, %v478_v63 }
 0x11a   :  { %v896_v4 = vpop.f32.mrf.mxu0 }
 0x11b   :  { %v309_v6 = vadd.f32 %v895_v2, %v1394_v39  ;;  %v479_v7 = vmax.f32 %v449_v3, 0.0 }
 0x11c   :  { %v897_v8 = vpop.f32.mrf.mxu0 }
 0x11d   :  { %v454_v9 = vadd.f32 %v989_v55, %v309_v6  ;;  %v898_v10 = vadd.f32 %v897_v8, %v896_v4  ;;  %1027 = vmatprep.mubr.msk.f32.mxu1 %vm498_vm2, %v479_v7 }
 0x11e   :  { %v899_v11 = vpop.f32.mrf.mxu0 }
 0x11f   :  { %v480_v13 = vmax.f32 %v454_v9, 0.0  ;;  %v314_v14 = vadd.f32 %v898_v10, %v1394_v39  ;;  %v765_v9 = vpop.permute.xlu1 %764 }
 0x120   :  { %v900_v15 = vpop.f32.mrf.mxu0 }
 0x121   :  { %v901_v16 = vadd.f32 %v900_v15, %v899_v11  ;;  %v459_v17 = vadd.f32 %v458_v12, %v314_v14  ;;  %1028 = vmatmul.mubr.msk.f32.gmra.mxu1 %vm498_vm2, %v480_v13 }
 0x123   :  { %v319_v18 = vadd.f32 %v901_v16, %v1394_v39  ;;  %v481_v19 = vmax.f32 %v459_v17, 0.0  ;;  %v805_v39 = vld [vmem:[%s1446_s4] ss:$0 sm:$0xff]  ;;  %v767_v16 = vlaneseq }
 0x125   :  { %v464_v20 = vadd.f32 %v992_v5, %v319_v18  ;;  %1030 = vmatprep.mubr.msk.f32.mxu1 %vm498_vm2, %v481_v19  ;;  %v768_v19 = vshrl.u32 %v767_v16, 7 }
 0x127   :  { %v482_v21 = vmax.f32 %v464_v20, 0.0  ;;  %v769_v22 = vsub.s32 0, %v768_v19 }
 0x129   :  { %1031 = vmatmul.mubr.msk.f32.gmra.mxu1 %vm498_vm2, %v482_v21 }
 0x17d   :  { %v745_v10 = vpop.permute.xlu0 %744 }
 0x181   :  { %v750_v12 = vpop.permute.xlu0 %749 }
 0x1b1   :  { %v1011_v24 = vpop.f32.mrf.mxu1 }
 0x1b2   :  { %v619_v27 = vadd.f32 %v1011_v24, %v805_v39 }
 0x1b3   :  { %v613_v25 = vpop.f32.mrf.mxu1 }
 0x1b4   :  { %v614_v26 = vadd.f32 %v805_v39, %v613_v25  ;;  %v693_v30 = vmax.f32 %v619_v27, 0.0 }
 0x1b6   :  { %v692_v28 = vmax.f32 %v614_v26, 0.0 }
 0x1b8   :  { %708 = vxpose.xlu1.b32.start [1/16] (narrow) %v692_v28, 16 }
 0x1b9   :  { %v1014_v29 = vpop.f32.mrf.mxu1 }
 0x1ba   :  { %v629_v33 = vadd.f32 %v1014_v29, %v805_v39 }
 0x1bb   :  { %v623_v31 = vpop.f32.mrf.mxu1 }
 0x1bc   :  { %v624_v32 = vadd.f32 %v805_v39, %v623_v31  ;;  %709 = vxpose.xlu1.b32.cont [2/16] (narrow) %v693_v30, 16  ;;  %v695_v36 = vmax.f32 %v629_v33, 0.0 }
 0x1be   :  { %v694_v34 = vmax.f32 %v624_v32, 0.0 }
 0x1c0   :  { %710 = vxpose.xlu1.b32.cont [3/16] (narrow) %v694_v34, 16 }
 0x1c1   :  { %v1017_v35 = vpop.f32.mrf.mxu1 }
 0x1c2   :  { %v639_v40 = vadd.f32 %v1017_v35, %v805_v39 }
 0x1c3   :  { %v633_v37 = vpop.f32.mrf.mxu1 }
 0x1c4   :  { %v634_v38 = vadd.f32 %v805_v39, %v633_v37  ;;  %711 = vxpose.xlu1.b32.cont [4/16] (narrow) %v695_v36, 16  ;;  %v697_v43 = vmax.f32 %v639_v40, 0.0 }
 0x1c6   :  { %v696_v41 = vmax.f32 %v634_v38, 0.0 }
 0x1c8   :  { %712 = vxpose.xlu1.b32.cont [5/16] (narrow) %v696_v41, 16 }
 0x1c9   :  { %v1020_v42 = vpop.f32.mrf.mxu1 }
 0x1ca   :  { %v649_v46 = vadd.f32 %v1020_v42, %v805_v39 }
 0x1cb   :  { %v643_v44 = vpop.f32.mrf.mxu1 }
 0x1cc   :  { %v644_v45 = vadd.f32 %v805_v39, %v643_v44  ;;  %713 = vxpose.xlu1.b32.cont [6/16] (narrow) %v697_v43, 16  ;;  %v699_v49 = vmax.f32 %v649_v46, 0.0 }
 0x1ce   :  { %v698_v47 = vmax.f32 %v644_v45, 0.0 }
 0x1d0   :  { %714 = vxpose.xlu1.b32.cont [7/16] (narrow) %v698_v47, 16 }
 0x1d1   :  { %v1023_v48 = vpop.f32.mrf.mxu1 }
 0x1d2   :  { %v659_v52 = vadd.f32 %v1023_v48, %v805_v39 }
 0x1d3   :  { %v653_v50 = vpop.f32.mrf.mxu1 }
 0x1d4   :  { %v654_v51 = vadd.f32 %v805_v39, %v653_v50  ;;  %715 = vxpose.xlu1.b32.cont [8/16] (narrow) %v699_v49, 16  ;;  %v701_v55 = vmax.f32 %v659_v52, 0.0 }
 0x1d6   :  { %v700_v53 = vmax.f32 %v654_v51, 0.0 }
 0x1d8   :  { %716 = vxpose.xlu1.b32.cont [9/16] (narrow) %v700_v53, 16 }
 0x1d9   :  { %v1026_v54 = vpop.f32.mrf.mxu1 }
 0x1da   :  { %v669_v58 = vadd.f32 %v1026_v54, %v805_v39 }
 0x1db   :  { %v663_v56 = vpop.f32.mrf.mxu1 }
 0x1dc   :  { %v664_v57 = vadd.f32 %v805_v39, %v663_v56  ;;  %717 = vxpose.xlu1.b32.cont [10/16] (narrow) %v701_v55, 16  ;;  %v703_v61 = vmax.f32 %v669_v58, 0.0 }
 0x1de   :  { %v702_v59 = vmax.f32 %v664_v57, 0.0 }
 0x1e0   :  { %718 = vxpose.xlu1.b32.cont [11/16] (narrow) %v702_v59, 16 }
 0x1e1   :  { %v1029_v60 = vpop.f32.mrf.mxu1 }
 0x1e2   :  { %v679_v0 = vadd.f32 %v1029_v60, %v805_v39 }
 0x1e3   :  { %v673_v62 = vpop.f32.mrf.mxu1 }
 0x1e4   :  { %v674_v63 = vadd.f32 %v805_v39, %v673_v62  ;;  %719 = vxpose.xlu1.b32.cont [12/16] (narrow) %v703_v61, 16  ;;  %v705_v3 = vmax.f32 %v679_v0, 0.0 }
 0x1e6   :  { %v704_v1 = vmax.f32 %v674_v63, 0.0 }
 0x1e8   :  { %720 = vxpose.xlu1.b32.cont [13/16] (narrow) %v704_v1, 16 }
 0x1e9   :  { %v1032_v2 = vpop.f32.mrf.mxu1 }
 0x1ea   :  { %v689_v6 = vadd.f32 %v1032_v2, %v805_v39 }
 0x1eb   :  { %v683_v4 = vpop.f32.mrf.mxu1 }
 0x1ec   :  { %v684_v5 = vadd.f32 %v805_v39, %v683_v4  ;;  %721 = vxpose.xlu1.b32.cont [14/16] (narrow) %v705_v3, 16  ;;  %v707_v8 = vmax.f32 %v689_v6, 0.0  ;;  %v770_v39 = vrot.slane %v765_v9, %v769_v22 }
 0x1ee   :  { %v706_v7 = vmax.f32 %v684_v5, 0.0 }
 0x1f0   :  { %722 = vxpose.xlu1.b32.cont [15/16] (narrow) %v706_v7, 16 }
 0x1f4   :  { %723 = vxpose.xlu1.b32.end [16/16] (narrow) %v707_v8, 16 }
 0x234   :  { %v724_v11 = vpop.trf.xlu1 }
 0x235   :  { %v752_v14 = vmul.f32 %v745_v10, %v724_v11 }
 0x238   :  { %v725_v13 = vpop.trf.xlu1 }
 0x239   :  { %v753_v15 = vmul.f32 %v750_v12, %v725_v13 }
 0x23b   :  { %v754_v17 = vadd.f32 %v753_v15, %v752_v14 }
 0x23d   :  { %v755_v18 = vrot.slane %v754_v17, 4 }
 0x23f   :  { %v756_v20 = vadd.f32 %v755_v18, %v754_v17 }
 0x241   :  { %v757_v21 = vrot.slane %v756_v20, 2 }
 0x243   :  { %v758_v23 = vadd.f32 %v757_v21, %v756_v20 }
 0x245   :  { %v759_v24 = vrot.slane %v758_v23, 1 }
 0x247   :  { %v760_v25 = vadd.f32 %v759_v24, %v758_v23 }
 0x249   :  { %v771_v26 = vadd.f32 %v770_v39, %v760_v25 }
 0x24b   :  { %v772_v27 = vand.u32 2147483647, %v771_v26  ;;  %vm776_vm3 = vcmp.ge.f32.partialorder %v771_v26, 0.0 }
 0x24d   :  { %v773_v28 = vsub.f32 0.0, %v772_v27 }
 0x24f   :  { %v774_v29 = vmul.f32 1.442695, %v773_v28 }
 0x251   :  { %1036 = vpow2.f32 %v774_v29 }
 0x25e   :  { %v1037_v30 = vpop.eup %1036 }
 0x25f   :  { %v777_v31 = vadd.f32 1.0, %v1037_v30 }
 0x261   :  { %1038 = vrcp.f32 %v777_v31 }
 0x26e   :  { %v1039_v32 = vpop.eup %1038 }
 0x26f   :  { %v780_v33 = vmul.f32 %v1039_v32, %v1037_v30 }
 0x271   :  { %v781_v34 = vsel %vm776_vm3, %v1039_v32, %v780_v33 }
 0x272   :  { %782 = vst [vmem:[%s1447_s7] sm:$0x1] %v781_v34 }

</bundles_post_ra>
